<compile_context>
chip_gen: v6e
topology: v6e:2x2x1
jax: 0.10.0
libtpu: 0.0.40
codegen_flags: <defaults>
</compile_context>

<pallas_src>
import jax
import jax.numpy as jnp
from jax.experimental import pallas as pl
from jax.experimental.pallas import tpu as pltpu


# ----------------------------- Pallas kernel --------------------------------

def _linear_kernel(x_ref, w_ref, o_ref):
    # x: [tn, K] (caller dtype), w: [K, d_out] f32 -> o: [tn, d_out] f32.
    # Natural MXU orientation: contraction over the lane dim of x needs no
    # transpose of the big tile; the f32 upcast of x is free VPU filler under DMA.
    o_ref[...] = jnp.dot(
        x_ref[...].astype(jnp.float32),
        w_ref[...],
        preferred_element_type=jnp.float32,
    )


# ------------------------------- glue ---------------------------------------

def _vmem_budgets():
    """(double-buffer budget for the streamed tiles, scoped vmem limit), per gen."""
    try:
        cap = pltpu.get_tpu_info().vmem_capacity_bytes
    except Exception:
        cap = 128 * 1024 * 1024
    if cap <= 64 * 1024 * 1024:
        # v7x: 64 MiB VMEM per TensorCore -- leave headroom for Mosaic scratch.
        return 40 * 1024 * 1024, 48 * 1024 * 1024
    # v5e / v6e: 128 MiB physical VMEM.
    return 32 * 1024 * 1024, 64 * 1024 * 1024


def _pick_tile_n(n, d_k, in_itemsize, budget_bytes):
    """Node tile that fills the double-buffer budget, with >=2 even grid steps."""
    if n <= 1024:
        # Tiny problem: one full-extent block; splitting just adds per-step overhead.
        return n
    lane_k = max(1, pl.cdiv(d_k, 128)) * 128      # x tile is lane-padded in VMEM
    # double-buffered input tile + double-buffered (lane-padded to 128) f32 output tile
    per_row = 2 * lane_k * in_itemsize + 2 * 128 * 4
    budget = max(per_row * 128, budget_bytes - (1 << 20))   # slack for the tiny weight
    tn = max(128, (budget // per_row) // 128 * 128)
    # Guarantee >= 2 steps (v7x megacore sharding of the "parallel" node axis)
    # and an even step count (no 1-of-3 imbalance between the two TensorCores).
    steps = max(2, pl.cdiv(n, tn))
    if steps % 2:
        steps += 1
    return max(128, pl.cdiv(pl.cdiv(n, steps), 128) * 128)


def _build_w(w0e, w1o, mul0, mul1, dipole_only):
    """Dense f32 weight [D_in, d_out] equivalent to the e3nn o3.Linear paths."""
    w1 = (w1o[:, 0] / jnp.sqrt(jnp.float32(mul1))).astype(jnp.float32)
    # [3*mul1, 3] with W[3*c + k, m] = w1[c] * (k == m)  (channel-major 1o layout)
    block_1o = (w1[:, None, None] * jnp.eye(3, dtype=jnp.float32)[None, :, :]).reshape(
        3 * mul1, 3
    )
    vec_cols = jnp.concatenate(
        [jnp.zeros((mul0, 3), jnp.float32), block_1o], axis=0
    )  # [D_in, 3]; 0e rows are zero -> kernel can read full x in dipole_only mode
    if dipole_only:
        return vec_cols
    w0 = (w0e[:, 0] / jnp.sqrt(jnp.float32(mul0))).astype(jnp.float32)
    scal_col = jnp.concatenate([w0, jnp.zeros((3 * mul1,), jnp.float32)])[:, None]
    return jnp.concatenate([scal_col, vec_cols], axis=1)  # [D_in, 4]


def linear_dipole_readout(x, w0e, w1o, *, dipole_only: bool = False, tile_n=None):
    """Equivalent of LinearDipoleReadoutBlock.forward.

    x   : [N, D_in] with D_in = mul0 + 3*mul1 (irreps_in = "{mul0}x0e + {mul1}x1o")
    w0e : [mul0, 1] weights for the 0e -> 0e path (unused if dipole_only)
    w1o : [mul1, 1] weights for the 1o -> 1o path
    Returns float32 [N, 4] ("1x0e + 1x1o") or [N, 3] ("1x1o").
    """
    N, D_in = x.shape
    mul0, mul1 = w0e.shape[0], w1o.shape[0]
    assert D_in == mul0 + 3 * mul1
    d_out = 3 if dipole_only else 4

    w = _build_w(w0e, w1o, mul0, mul1, dipole_only)        # [D_in, d_out] f32

    in_itemsize = jnp.dtype(x.dtype).itemsize
    budget, vmem_limit = _vmem_budgets()
    tn = tile_n if tile_n is not None else _pick_tile_n(N, D_in, in_itemsize, budget)
    if tn < N:
        # lane/sublane (8,128) block rule; keep it at 128 for safety across dtypes
        assert tn % 128 == 0, "tile_n must be a multiple of 128 when smaller than N"
    grid = (pl.cdiv(N, tn),)   # tail block is padded/masked by Pallas

    cost = pl.CostEstimate(
        flops=2 * N * D_in * d_out,
        transcendentals=0,
        bytes_accessed=N * D_in * in_itemsize + D_in * d_out * 4 + N * d_out * 4,
    )

    out = pl.pallas_call(
        _linear_kernel,
        out_shape=jax.ShapeDtypeStruct((N, d_out), jnp.float32),
        grid=grid,
        in_specs=[
            pl.BlockSpec((tn, D_in), lambda i: (i, 0)),     # node tile of x (streamed)
            pl.BlockSpec((D_in, d_out), lambda i: (0, 0)),  # whole (tiny) weight
        ],
        out_specs=pl.BlockSpec((tn, d_out), lambda i: (i, 0)),  # module layout, no transpose
        compiler_params=pltpu.CompilerParams(
            dimension_semantics=("parallel",),               # megacore shard on v7x
            vmem_limit_bytes=vmem_limit,
        ),
        cost_estimate=cost,
    )(x, w)

    return out


# --------------------------- reference & self-test ---------------------------

def _reference(x, w0e, w1o, dipole_only=False):
    N = x.shape[0]
    mul0, mul1 = w0e.shape[0], w1o.shape[0]
    x32 = x.astype(jnp.float32)
    x_1o = x32[:, mul0:].reshape(N, mul1, 3)
    ref_1o = jnp.einsum("ncm,c->nm", x_1o, w1o[:, 0].astype(jnp.float32)) / jnp.sqrt(
        jnp.float32(mul1)
    )
    if dipole_only:
        return ref_1o
    ref_0e = x32[:, :mul0] @ (w0e.astype(jnp.float32) / jnp.sqrt(jnp.float32(mul0)))
    return jnp.concatenate([ref_0e, ref_1o], axis=-1)


if __name__ == "__main__":
    key = jax.random.PRNGKey(0)
    k_x, k_w0, k_w1, k_x2 = jax.random.split(key, 4)

    # irreps_in = "8x0e + 8x1o"  ->  D_in = 8 + 24 = 32
    mul0, mul1 = 8, 8
    D_in = mul0 + 3 * mul1
    w0e = jax.random.normal(k_w0, (mul0, 1), jnp.float32)
    w1o = jax.random.normal(k_w1, (mul1, 1), jnp.float32)

    # -- test 1: small N, full "1x0e + 1x1o" readout --
    N = 16
    x = jax.random.normal(k_x, (N, D_in), jnp.float32)
    out = jax.block_until_ready(linear_dipole_readout(x, w0e, w1o))
    ref = _reference(x, w0e, w1o)
    assert out.shape == (N, 4) and out.dtype == jnp.float32
    assert jnp.allclose(out, ref, atol=1e-4, rtol=1e-4)

    # -- test 2: multi-block grid with masked tail (N not a multiple of the tile) --
    N2 = 300
    x2 = jax.random.normal(k_x2, (N2, D_in), jnp.float32)
    out2 = jax.block_until_ready(linear_dipole_readout(x2, w0e, w1o, tile_n=128))
    ref2 = _reference(x2, w0e, w1o)
    assert out2.shape == (N2, 4)
    assert jnp.allclose(out2, ref2, atol=1e-4, rtol=1e-4)

    # -- test 3: dipole_only ("1x1o") readout (full x read; 0e weight rows are zero) --
    out3 = jax.block_until_ready(linear_dipole_readout(x, w0e, w1o, dipole_only=True))
    ref3 = _reference(x, w0e, w1o, dipole_only=True)
    assert out3.shape == (N, 3)
    assert jnp.allclose(out3, ref3, atol=1e-4, rtol=1e-4)

    # -- test 4: bf16 activations (halves HBM read bytes; output stays f32) --
    out4 = jax.block_until_ready(linear_dipole_readout(x.astype(jnp.bfloat16), w0e, w1o))
    assert out4.shape == (N, 4) and out4.dtype == jnp.float32
    assert jnp.all(jnp.isfinite(out4))
    assert jnp.allclose(out4, ref, atol=0.1, rtol=0.05)

    # -- test 5: auto tile picker on a larger N (exercises the even-step / budget path) --
    N3 = 5000
    x3 = jax.random.normal(k_x2, (N3, D_in), jnp.float32)
    out5 = jax.block_until_ready(linear_dipole_readout(x3, w0e, w1o))
    ref5 = _reference(x3, w0e, w1o)
    assert out5.shape == (N3, 4)
    assert jnp.allclose(out5, ref5, atol=1e-4, rtol=1e-4)

    print("KERNEL_OK")
</pallas_src>

<mosaic_0001>
module attributes {stable_mosaic.version = 11 : i64} {
  func.func @_linear_kernel(%arg0: i32, %arg1: memref<16x32xf32, #tpu.memory_space<vmem>>, %arg2: memref<32x4xf32, #tpu.memory_space<vmem>>, %arg3: memref<16x4xf32, #tpu.memory_space<vmem>>) attributes {dimension_semantics = [#tpu.dimension_semantics<parallel>], iteration_bounds = array<i64: 1>, scalar_prefetch = 0 : i64, scratch_operands = 0 : i64, tpu.core_type = #tpu.core_type<tc>, window_params = [{transform_indices = @transform_0, window_bounds = array<i64: 16, 32>}, {pipeline_mode = #tpu.pipeline_mode<synchronous>, transform_indices = @transform_1, window_bounds = array<i64: 32, 4>}, {transform_indices = @transform_2, window_bounds = array<i64: 16, 4>}]} {
    %c0 = arith.constant 0 : index
    %c0_0 = arith.constant 0 : index
    %0 = vector.load %arg1[%c0, %c0_0] : memref<16x32xf32, #tpu.memory_space<vmem>>, vector<16x32xf32>
    %c0_1 = arith.constant 0 : index
    %c0_2 = arith.constant 0 : index
    %1 = vector.load %arg2[%c0_1, %c0_2] : memref<32x4xf32, #tpu.memory_space<vmem>>, vector<32x4xf32>
    %cst = arith.constant dense<0.000000e+00> : vector<16x4xf32>
    %2 = tpu.matmul %0, %1, %cst {dimension_numbers = #tpu.dot_dimension_numbers<[1], [0], [0], [1], [0, 0, 1, 1], [], []>} : vector<16x32xf32>, vector<32x4xf32>, vector<16x4xf32> -> vector<16x4xf32>
    %c0_3 = arith.constant 0 : index
    %c0_4 = arith.constant 0 : index
    %3 = vector.load %arg3[%c0_3, %c0_4] : memref<16x4xf32, #tpu.memory_space<vmem>>, vector<16x4xf32>
    tpu.vector_store %arg3[%c0_3, %c0_4], %2 {strides = array<i32>} : memref<16x4xf32, #tpu.memory_space<vmem>>, vector<16x4xf32>,
    return
  }
  func.func @transform_0(%arg0: i32) -> (i32, i32) {
    %c0_i32 = arith.constant 0 : i32
    %c0_i32_0 = arith.constant 0 : i32
    return %arg0, %c0_i32 : i32, i32
  }
  func.func @transform_1(%arg0: i32) -> (i32, i32) {
    %c0_i32 = arith.constant 0 : i32
    %c0_i32_0 = arith.constant 0 : i32
    %c0_i32_1 = arith.constant 0 : i32
    return %c0_i32, %c0_i32_0 : i32, i32
  }
  func.func @transform_2(%arg0: i32) -> (i32, i32) {
    %c0_i32 = arith.constant 0 : i32
    %c0_i32_0 = arith.constant 0 : i32
    return %arg0, %c0_i32 : i32, i32
  }
}

</mosaic_0001>

<bundles_post_ra>
// kernel: tpu_custom_call.1
= control target key start
LH: loop header
LB: loop body
LE: loop exit
PB: predicated region body
PF: predicated region fallthrough
CT: control target
= control target key end

     0   :  { %vm17_vm0 = vcmask 261120   ;;  %vm99_vm1 = vcmask 31744   ;;  %s166_s1 = inlined_call_operand.vmem [shape: f32[32,4], index: 1, kind: input, shape index: {}]   ;;  %s167_s0 = inlined_call_operand.vmem [shape: f32[16,32], index: 0, kind: input, shape index: {}]   ;;  %s168_s2 = inlined_call_operand.vmem [shape: f32[16,4], index: 2, kind: output, shape index: {}]  }
   0x1   :  { %v16_v0 = vld [vmem:[%s166_s1 + $0x18] sm:$0xff]  ;;  %v15_v1 = vld [vmem:[%s166_s1 + $0x10] sm:$0xff]  ;;  %v11_v2 = vld [vmem:[%s167_s0] sm:$0xff] }
   0x2   :  { %114 = vmatprep.subr.mxu0 %v16_v0  ;;  %v14_v3 = vld [vmem:[%s166_s1 + $0x8] sm:$0xff]  ;;  %122 = vmatprep.mubr.msk.f32.mxu0 %vm17_vm0, %v11_v2  ;;  %v13_v4 = vld [vmem:[%s166_s1] sm:$0xff] }
   0x3   :  { %115 = vmatpush3.msra.mxu0 %v16_v0  ;;  %v12_v5 = vld [vmem:[%s167_s0 + $0x8] sm:$0xff] }
   0x4   :  { %116 = vmatprep.subr.mxu0 %v15_v1 }
   0x5   :  { %117 = vmatpush3.msra.mxu0 %v15_v1 }
   0x6   :  { %118 = vmatprep.subr.mxu0 %v14_v3 }
   0x7   :  { %119 = vmatpush3.msra.mxu0 %v14_v3 }
   0x8   :  { %120 = vmatprep.subr.mxu0 %v13_v4 }
   0x9   :  { %121 = vmatpush3.msra.mxu0 %v13_v4 }
   0xa   :  { %123 = vmatmul.mubr.msk.f32.vlgmr.msra.gmra.mxu0 %vm17_vm0, %v12_v5 }
  0xca   :  { %v124_v6 = vpop.f32.mrf.mxu0 }
  0xcb   :  { %101 = vst.msk [vmem:[%s168_s2 + $0x8] sm:$0xff] %vm99_vm1, %v124_v6 }
  0xcc   :  { %v90_v7 = vpop.f32.mrf.mxu0 }
  0xcd   :  { %100 = vst.msk [vmem:[%s168_s2] sm:$0xff] %vm99_vm1, %v90_v7 }

</bundles_post_ra>
